<compile_context>
chip_gen: v7x
topology: tpu7x:2x2x1
jax: 0.10.0
libtpu: 0.0.40
codegen_flags: <defaults>
</compile_context>

<pallas_src>
import functools

import jax
import jax.numpy as jnp
from jax import lax
from jax.experimental import pallas as pl
from jax.experimental.pallas import tpu as pltpu


def _dwconv1d_kernel(x_ref, w_ref, o_ref, *scratch, kernel_size, stride, padding,
                     multiplier, pad_left, t_chunk, use_stage, phase_lens):
    # x_ref : (block_ci, T_in)    input-channel block, original dtype
    # w_ref : (block_co, K)       f32 taps for the matching out channels
    # o_ref : (block_co, T_out)   output tile
    # scratch (optional):
    #   xs_ref : (block_co, T_stage)            zero-padded / channel-expanded staging
    #   ph_ref : (n_phase, block_co, max_plen)  dense deinterleaved phases (stride > 1)
    block_co, t_out = o_ref.shape
    block_ci, t_in = x_ref.shape
    base = pad_left - padding          # staging index of padded-coordinate 0

    si = 0
    xs_ref = None
    if use_stage:
        xs_ref = scratch[si]
        si += 1
        stage_dt = xs_ref.dtype
        t_stage = xs_ref.shape[-1]
        if pad_left > 0:
            # Lane-aligned left zero region (covers the semantic left padding).
            xs_ref[:, 0:pad_left] = jnp.zeros((block_co, pad_left), stage_dt)
        if multiplier == 1:
            xs_ref[:, pad_left:pad_left + t_in] = x_ref[...].astype(stage_dt)
        else:
            # Exact channel expansion out_ch = in_ch * m + j  <=>  staged rows
            # i*m .. i*m+m-1 all read input row i.  Static unit-stride stores only:
            # no MXU selection matmul, no dot-precision hazard.
            # TODO(synk): a single sublane-strided store per j would use fewer ops
            # if strided sublane stores prove profitable on the target.
            for i in range(block_ci):
                row = x_ref[i:i + 1, :].astype(stage_dt)            # (1, T_in)
                xs_ref[i * multiplier:(i + 1) * multiplier,
                       pad_left:pad_left + t_in] = jnp.broadcast_to(
                           row, (multiplier, t_in))
        right = t_stage - (pad_left + t_in)
        if right > 0:
            xs_ref[:, pad_left + t_in:t_stage] = jnp.zeros((block_co, right), stage_dt)

    ph_ref = None
    if stride > 1:
        ph_ref = scratch[si]
        si += 1
        src = xs_ref if use_stage else x_ref
        # Deinterleave once into dense phases so every tap read in the hot loop
        # is a unit-stride lane slice (no per-tap strided loads, no live phases).
        for r, plen in enumerate(phase_lens):
            p0 = 0
            while p0 < plen:
                pw = min(t_chunk, plen - p0)
                seg = src[:, pl.ds(base + r + p0 * stride, pw, stride=stride)]
                ph_ref[r, :, p0:p0 + pw] = seg.astype(ph_ref.dtype)
                p0 += pw

    def chunk_body(t0, cw):
        # Bounded accumulator: block_co * cw * 4B <= ~128 KiB (<= ~32 vregs).
        acc = jnp.zeros((block_co, cw), jnp.float32)
        for k in range(kernel_size):
            wk = w_ref[:, k:k + 1]                                  # (block_co, 1) f32
            if stride == 1:
                if use_stage:
                    seg = xs_ref[:, pl.ds(base + k + t0, cw)]
                else:
                    seg = x_ref[:, pl.ds(k + t0, cw)]
            else:
                r, q = k % stride, k // stride
                seg = ph_ref[r, :, pl.ds(q + t0, cw)]
            acc = acc + seg.astype(jnp.float32) * wk
        o_ref[:, pl.ds(t0, cw)] = acc.astype(o_ref.dtype)

    n_full = t_out // t_chunk
    rem = t_out - n_full * t_chunk
    if 0 < n_full <= 8:
        # Short static chunk loop (fully unrolled for LLO scheduling).
        for i in range(n_full):
            chunk_body(i * t_chunk, t_chunk)
    elif n_full > 8:
        aligned = (t_chunk % 128 == 0)

        def body(i, carry):
            t0 = i * t_chunk
            if aligned:
                t0 = pl.multiple_of(t0, 128)
            chunk_body(t0, t_chunk)
            return carry

        lax.fori_loop(0, n_full, body, 0)
    if rem > 0:
        chunk_body(n_full * t_chunk, rem)


def _vmem_budgets():
    """Generation-aware per-step working-set budget and compiler VMEM limit."""
    try:
        cap = int(pltpu.get_tpu_info().vmem_capacity_bytes)
    except Exception:
        cap = 64 * 1024 * 1024          # conservative default (v7x per-TC VMEM)
    step_budget = max(4 << 20, min(cap // 5, 24 << 20))        # ~24MiB v5e/v6e, ~12MiB v7x
    vmem_limit = max(32 << 20, min((cap * 3) // 4, 96 << 20))  # 96MiB v5e/v6e, 48MiB v7x
    return step_budget, vmem_limit


def _pick_t_chunk(block_co, t_out):
    """Output-time chunk width keeping the f32 accumulator <= ~128 KiB."""
    cw = (32768 // max(block_co, 1)) // 128 * 128
    cw = max(128, min(cw, 2048))
    return max(1, min(cw, t_out))


def depthwise_conv1d(inputs, weight, *, stride: int = 1, padding: int = 0):
    """Depthwise 1-D conv matching nn.Conv1d(groups=in_channels, bias=False).

    inputs: (batch, in_channels, time)
    weight: (out_channels, 1, kernel_size)   (PyTorch grouped-conv layout)
    returns: (batch, out_channels, t_out), t_out = (time + 2*padding - K)//stride + 1
    """
    batch, c_in, t_in = inputs.shape
    c_out, _, kernel_size = weight.shape
    assert c_out % c_in == 0, "out_channels must be a multiple of in_channels"
    multiplier = c_out // c_in
    t_out = (t_in + 2 * padding - kernel_size) // stride + 1
    assert t_out > 0, "output length must be positive"

    # Staging dtype: keep bf16 inputs in bf16 (halves staged VMEM bytes per tap
    # on v6e/v7x); anything else is staged in f32.  Accumulation is always f32.
    if inputs.dtype == jnp.float32 or inputs.dtype == jnp.bfloat16:
        stage_dtype = inputs.dtype
    else:
        stage_dtype = jnp.float32

    use_stage = (padding > 0) or (multiplier > 1)
    pad_left = 0 if padding == 0 else (-(-padding // 128)) * 128    # lane-aligned
    base = pad_left - padding
    t_stage = (max(pad_left + t_in, base + (t_out - 1) * stride + kernel_size)
               if use_stage else 0)

    n_phase = min(stride, kernel_size) if stride > 1 else 0
    phase_lens = tuple(t_out + (kernel_size - 1 - r) // stride for r in range(n_phase))
    max_plen = max(phase_lens) if phase_lens else 0

    # Weights: (C_out, 1, K) -> (C_out, K) f32 once; hot loop stays pure f32 FMA.
    w2d = weight[:, 0, :].astype(jnp.float32)

    in_isz = jnp.dtype(inputs.dtype).itemsize
    st_isz = jnp.dtype(stage_dtype).itemsize
    step_budget, vmem_limit = _vmem_budgets()

    def footprint(bci):
        bco = bci * multiplier
        fb = (2 * bci * t_in * in_isz           # double-buffered input tile
              + 2 * bco * t_out * in_isz        # double-buffered output tile
              + 2 * bco * kernel_size * 4)      # (tiny) weight tile
        if use_stage:
            fb += bco * t_stage * st_isz
        if n_phase:
            fb += n_phase * bco * max_plen * st_isz
        return fb + (1 << 20)                   # headroom: live acc / slice temps

    cands = sorted({c_in, *[d for d in range(8, c_in, 8) if c_in % d == 0]},
                   reverse=True)
    small = [c for c in cands if c * multiplier <= 256]   # bound per-chunk acc vregs
    if small:
        cands = small
    fitting = [c for c in cands if footprint(c) <= step_budget]
    if not fitting:
        block_ci = min(cands, key=footprint)
        # TODO(synk): also tile the time axis with a (K-1)*stride halo for very
        # long sequences instead of only shrinking the channel block.
    else:
        block_ci = fitting[0]                   # largest block that fits ...
        for c in fitting:                       # ... but prefer >= 4 grid steps
            if batch * (c_in // c) >= 4:        #     (v7x megacore + pipelining)
                block_ci = c
                break
    block_co = block_ci * multiplier
    t_chunk = _pick_t_chunk(block_co, t_out)
    # batch innermost: the weight block index is constant there -> no per-step re-DMA.
    grid = (c_in // block_ci, batch)

    scratch_shapes = []
    if use_stage:
        scratch_shapes.append(pltpu.VMEM((block_co, t_stage), stage_dtype))
    if n_phase:
        scratch_shapes.append(pltpu.VMEM((n_phase, block_co, max_plen), stage_dtype))

    kernel = functools.partial(
        _dwconv1d_kernel, kernel_size=kernel_size, stride=stride, padding=padding,
        multiplier=multiplier, pad_left=pad_left, t_chunk=t_chunk,
        use_stage=use_stage, phase_lens=phase_lens)

    cost = pl.CostEstimate(
        flops=2 * batch * c_out * kernel_size * t_out,
        transcendentals=0,
        bytes_accessed=int(inputs.size * in_isz + w2d.size * 4
                           + batch * c_out * t_out * in_isz))

    return pl.pallas_call(
        kernel,
        out_shape=jax.ShapeDtypeStruct((batch, c_out, t_out), inputs.dtype),
        grid_spec=pltpu.PrefetchScalarGridSpec(
            num_scalar_prefetch=0,
            grid=grid,
            in_specs=[
                # Original, un-padded, un-expanded activation: one channel block,
                # full (lane-dense) time axis.  Batch dim squeezed (None).
                pl.BlockSpec((None, block_ci, t_in), lambda c, b: (b, c, 0)),
                # Matching out-channel rows of the pre-cast f32 weights.
                pl.BlockSpec((block_co, kernel_size), lambda c, b: (c, 0)),
            ],
            out_specs=pl.BlockSpec((None, block_co, t_out), lambda c, b: (b, c, 0)),
            scratch_shapes=scratch_shapes,
        ),
        compiler_params=pltpu.CompilerParams(
            dimension_semantics=("parallel", "parallel"),
            vmem_limit_bytes=vmem_limit,
        ),
        cost_estimate=cost,
    )(inputs, w2d)


if __name__ == "__main__":
    def _reference(x, w, stride, padding):
        return jax.lax.conv_general_dilated(
            x, w, window_strides=(stride,), padding=[(padding, padding)],
            dimension_numbers=("NCH", "OIH", "NCH"),
            feature_group_count=x.shape[1])

    key = jax.random.PRNGKey(0)
    keys = jax.random.split(key, 8)

    configs = [
        # (batch, c_in, t_in, multiplier, K, stride, padding)
        (2, 4, 16, 2, 3, 1, 1),   # channel multiplier 2 (out_channels = 2 * in_channels)
        (2, 8, 32, 1, 5, 1, 2),   # conformer-conv-module style, padded
        (2, 8, 32, 1, 3, 2, 1),   # strided (phase-deinterleave path)
        (2, 8, 32, 1, 3, 1, 0),   # no padding -> staging-free fast path
    ]
    for idx, (b, ci, t, m, k, s, p) in enumerate(configs):
        co = ci * m
        x = jax.random.normal(keys[2 * idx], (b, ci, t), dtype=jnp.float32)
        w = 0.1 * jax.random.normal(keys[2 * idx + 1], (co, 1, k), dtype=jnp.float32)
        out = jax.block_until_ready(depthwise_conv1d(x, w, stride=s, padding=p))
        ref = _reference(x, w, s, p)
        assert out.shape == ref.shape, (idx, out.shape, ref.shape)
        err = float(jnp.max(jnp.abs(out - ref)))
        assert err < 1e-5, (idx, err)

    print("KERNEL_OK")
</pallas_src>

<mosaic_0001>
module attributes {stable_mosaic.version = 11 : i64} {
  func.func @_dwconv1d_kernel(%arg0: i32, %arg1: i32, %arg2: memref<1x4x16xf32, #tpu.memory_space<vmem>>, %arg3: memref<8x3xf32, #tpu.memory_space<vmem>>, %arg4: memref<1x8x16xf32, #tpu.memory_space<vmem>>, %arg5: memref<8x145xf32, #tpu.memory_space<vmem>>) attributes {dimension_semantics = [#tpu.dimension_semantics<parallel>, #tpu.dimension_semantics<parallel>], iteration_bounds = array<i64: 1, 2>, scalar_prefetch = 0 : i64, scratch_operands = 1 : i64, tpu.core_type = #tpu.core_type<tc>, window_params = [{transform_indices = @transform_0, window_bounds = array<i64: 1, 4, 16>}, {transform_indices = @transform_1, window_bounds = array<i64: 8, 3>}, {transform_indices = @transform_2, window_bounds = array<i64: 1, 8, 16>}]} {
    %cst = arith.constant 0.000000e+00 : f32
    %0 = vector.broadcast %cst : f32 to vector<8x128xf32>
    %c0 = arith.constant 0 : index
    %c0_0 = arith.constant 0 : index
    %1 = vector.load %arg5[%c0, %c0_0] : memref<8x145xf32, #tpu.memory_space<vmem>>, vector<8x128xf32>
    tpu.vector_store %arg5[%c0, %c0_0], %0 {strides = array<i32>} : memref<8x145xf32, #tpu.memory_space<vmem>>, vector<8x128xf32>,
    %c0_1 = arith.constant 0 : index
    %c0_2 = arith.constant 0 : index
    %c0_3 = arith.constant 0 : index
    %2 = vector.load %arg2[%c0_1, %c0_2, %c0_3] : memref<1x4x16xf32, #tpu.memory_space<vmem>>, vector<1x1x16xf32>
    %3 = vector.shape_cast %2 : vector<1x1x16xf32> to vector<1x16xf32>
    %4 = vector.shape_cast %3 : vector<1x16xf32> to vector<1x16xf32>
    %5 = vector.broadcast %4 : vector<1x16xf32> to vector<2x16xf32>
    %c0_4 = arith.constant 0 : index
    %c128 = arith.constant 128 : index
    %6 = vector.load %arg5[%c0_4, %c128] : memref<8x145xf32, #tpu.memory_space<vmem>>, vector<2x16xf32>
    tpu.vector_store %arg5[%c0_4, %c128], %5 {strides = array<i32>} : memref<8x145xf32, #tpu.memory_space<vmem>>, vector<2x16xf32>,
    %c0_5 = arith.constant 0 : index
    %c1 = arith.constant 1 : index
    %c0_6 = arith.constant 0 : index
    %7 = vector.load %arg2[%c0_5, %c1, %c0_6] : memref<1x4x16xf32, #tpu.memory_space<vmem>>, vector<1x1x16xf32>
    %8 = vector.shape_cast %7 : vector<1x1x16xf32> to vector<1x16xf32>
    %9 = vector.shape_cast %8 : vector<1x16xf32> to vector<1x16xf32>
    %10 = vector.broadcast %9 : vector<1x16xf32> to vector<2x16xf32>
    %c2 = arith.constant 2 : index
    %c128_7 = arith.constant 128 : index
    %11 = vector.load %arg5[%c2, %c128_7] : memref<8x145xf32, #tpu.memory_space<vmem>>, vector<2x16xf32>
    tpu.vector_store %arg5[%c2, %c128_7], %10 {strides = array<i32>} : memref<8x145xf32, #tpu.memory_space<vmem>>, vector<2x16xf32>,
    %c0_8 = arith.constant 0 : index
    %c2_9 = arith.constant 2 : index
    %c0_10 = arith.constant 0 : index
    %12 = vector.load %arg2[%c0_8, %c2_9, %c0_10] : memref<1x4x16xf32, #tpu.memory_space<vmem>>, vector<1x1x16xf32>
    %13 = vector.shape_cast %12 : vector<1x1x16xf32> to vector<1x16xf32>
    %14 = vector.shape_cast %13 : vector<1x16xf32> to vector<1x16xf32>
    %15 = vector.broadcast %14 : vector<1x16xf32> to vector<2x16xf32>
    %c4 = arith.constant 4 : index
    %c128_11 = arith.constant 128 : index
    %16 = vector.load %arg5[%c4, %c128_11] : memref<8x145xf32, #tpu.memory_space<vmem>>, vector<2x16xf32>
    tpu.vector_store %arg5[%c4, %c128_11], %15 {strides = array<i32>} : memref<8x145xf32, #tpu.memory_space<vmem>>, vector<2x16xf32>,
    %c0_12 = arith.constant 0 : index
    %c3 = arith.constant 3 : index
    %c0_13 = arith.constant 0 : index
    %17 = vector.load %arg2[%c0_12, %c3, %c0_13] : memref<1x4x16xf32, #tpu.memory_space<vmem>>, vector<1x1x16xf32>
    %18 = vector.shape_cast %17 : vector<1x1x16xf32> to vector<1x16xf32>
    %19 = vector.shape_cast %18 : vector<1x16xf32> to vector<1x16xf32>
    %20 = vector.broadcast %19 : vector<1x16xf32> to vector<2x16xf32>
    %c6 = arith.constant 6 : index
    %c128_14 = arith.constant 128 : index
    %21 = vector.load %arg5[%c6, %c128_14] : memref<8x145xf32, #tpu.memory_space<vmem>>, vector<2x16xf32>
    tpu.vector_store %arg5[%c6, %c128_14], %20 {strides = array<i32>} : memref<8x145xf32, #tpu.memory_space<vmem>>, vector<2x16xf32>,
    %cst_15 = arith.constant 0.000000e+00 : f32
    %22 = vector.broadcast %cst_15 : f32 to vector<8x1xf32>
    %c0_16 = arith.constant 0 : index
    %c144 = arith.constant 144 : index
    %23 = vector.load %arg5[%c0_16, %c144] : memref<8x145xf32, #tpu.memory_space<vmem>>, vector<8x1xf32>
    tpu.vector_store %arg5[%c0_16, %c144], %22 {strides = array<i32>} : memref<8x145xf32, #tpu.memory_space<vmem>>, vector<8x1xf32>,
    %cst_17 = arith.constant 0.000000e+00 : f32
    %24 = vector.broadcast %cst_17 : f32 to vector<8x16xf32>
    %c0_18 = arith.constant 0 : index
    %c0_19 = arith.constant 0 : index
    %25 = vector.load %arg3[%c0_18, %c0_19] : memref<8x3xf32, #tpu.memory_space<vmem>>, vector<8x1xf32>
    %c0_20 = arith.constant 0 : index
    %c127 = arith.constant 127 : index
    %26 = vector.load %arg5[%c0_20, %c127] : memref<8x145xf32, #tpu.memory_space<vmem>>, vector<8x16xf32>
    %27 = vector.broadcast %25 : vector<8x1xf32> to vector<8x16xf32>
    %28 = arith.mulf %26, %27 : vector<8x16xf32>
    %29 = arith.addf %24, %28 : vector<8x16xf32>
    %c0_21 = arith.constant 0 : index
    %c1_22 = arith.constant 1 : index
    %30 = vector.load %arg3[%c0_21, %c1_22] : memref<8x3xf32, #tpu.memory_space<vmem>>, vector<8x1xf32>
    %c0_23 = arith.constant 0 : index
    %c128_24 = arith.constant 128 : index
    %31 = vector.load %arg5[%c0_23, %c128_24] : memref<8x145xf32, #tpu.memory_space<vmem>>, vector<8x16xf32>
    %32 = vector.broadcast %30 : vector<8x1xf32> to vector<8x16xf32>
    %33 = arith.mulf %31, %32 : vector<8x16xf32>
    %34 = arith.addf %29, %33 : vector<8x16xf32>
    %c0_25 = arith.constant 0 : index
    %c2_26 = arith.constant 2 : index
    %35 = vector.load %arg3[%c0_25, %c2_26] : memref<8x3xf32, #tpu.memory_space<vmem>>, vector<8x1xf32>
    %c0_27 = arith.constant 0 : index
    %c129 = arith.constant 129 : index
    %36 = vector.load %arg5[%c0_27, %c129] : memref<8x145xf32, #tpu.memory_space<vmem>>, vector<8x16xf32>
    %37 = vector.broadcast %35 : vector<8x1xf32> to vector<8x16xf32>
    %38 = arith.mulf %36, %37 : vector<8x16xf32>
    %39 = arith.addf %34, %38 : vector<8x16xf32>
    %c0_28 = arith.constant 0 : index
    %c0_29 = arith.constant 0 : index
    %c0_30 = arith.constant 0 : index
    %40 = vector.load %arg4[%c0_28, %c0_29, %c0_30] : memref<1x8x16xf32, #tpu.memory_space<vmem>>, vector<1x8x16xf32>
    %41 = vector.shape_cast %40 : vector<1x8x16xf32> to vector<8x16xf32>
    %42 = vector.shape_cast %39 : vector<8x16xf32> to vector<1x8x16xf32>
    tpu.vector_store %arg4[%c0_28, %c0_29, %c0_30], %42 {strides = array<i32>} : memref<1x8x16xf32, #tpu.memory_space<vmem>>, vector<1x8x16xf32>,
    return
  }
  func.func @transform_0(%arg0: i32, %arg1: i32) -> (i32, i32, i32) {
    %c0_i32 = arith.constant 0 : i32
    %c0_i32_0 = arith.constant 0 : i32
    return %arg1, %arg0, %c0_i32 : i32, i32, i32
  }
  func.func @transform_1(%arg0: i32, %arg1: i32) -> (i32, i32) {
    %c0_i32 = arith.constant 0 : i32
    %c0_i32_0 = arith.constant 0 : i32
    return %arg0, %c0_i32 : i32, i32
  }
  func.func @transform_2(%arg0: i32, %arg1: i32) -> (i32, i32, i32) {
    %c0_i32 = arith.constant 0 : i32
    %c0_i32_0 = arith.constant 0 : i32
    return %arg1, %arg0, %c0_i32 : i32, i32, i32
  }
}

</mosaic_0001>

<bundles_post_ra>
// kernel: tpu_custom_call.1
= control target key start
LH: loop header
LB: loop body
LE: loop exit
PB: predicated region body
PF: predicated region fallthrough
CT: control target
= control target key end

     0   :  { %7 = vsyncpa [#allocation4], 0  ;;  %s657_s0 = inlined_call_operand.vmem [shape: f32[2,4,16], index: 0, kind: input, shape index: {}]   ;;  %s658_s1 = inlined_call_operand.vmem [shape: f32[8,3], index: 1, kind: input, shape index: {}]   ;;  %s659_s2 = inlined_call_operand.hbm [shape: f32[2,8,16], index: 2, kind: output, shape index: {}]  }
   0x1   :  { %9 = vsyncpa [#allocation4 + $0x1], 0  ;;  %s542_s9 = smov 0   ;;  %s544_s10 = smov 0  }
   0x2   :  { %s546_s11 = smov 0   ;;  %s548_s12 = smov 0  }
   0x3   :  { %s550_s13 = smov 0   ;;  %s552_s14 = smov 0  }
   0x4 LB: > { %s358_s15 = sadd.s32 4294967295, %s517_s14   ;;  %s359_s16 = sadd.s32 4294967294, %s517_s14   ;;  %s517_s14 = sphi %s552_s14, %s15_s14   ;;  %s513_s13 = sphi %s550_s13, %s666_s13   ;;  %s509_s12 = sphi %s548_s12, %s665_s12   ;;  %s505_s11 = sphi %s546_s11, %s664_s11   ;;  %s501_s10 = sphi %s544_s10, %s663_s10   ;;  %s497_s9 = sphi %s542_s9, %s662_s9  }
   0x5   : > { %s24_s17 = sadd.s32 1, %s513_s13  ;;  %s90_s18 = sadd.s32 1, %s505_s11 }
   0x6   : > { %p25_p0 = scmp.ge.s32.totalorder %s24_s17, 2  ;;  %p100_p1 = scmp.ne.s32.totalorder %s505_s11, %s501_s10 }
   0x7   : > { %p101_p2 = scmp.eq.s32.totalorder %s358_s15, 1  ;;  %p106_p3 = scmp.ne.s32.totalorder %s501_s10, %s497_s9 }
   0x8   : > { %s668_s17 = smov (%p25_p0, %s24_s17), 0  ;;  %p107_p5 = scmp.eq.s32.totalorder %s359_s16, 1 }
   0x9   : > { %p582_p4 = por %p101_p2, %p100_p1  ;;  %s85_s20 = ssub.s32 %s513_s13, %s668_s17 }
   0xa   : > { %p363_p6 = scmp.ge.s32.totalorder %s517_s14, 1  ;;  %p88_p7 = scmp.eq.s32.totalorder %s85_s20, 0 }
   0xb   : > { %p589_p8 = por %p107_p5, %p106_p3  ;;  %p142_p9 = scmp.lt.s32.totalorder %s517_s14, 3 }
   0xc   : > { %s595_s22 = scalar_select %p88_p7, %s505_s11, %s90_s18  }
   0xd   : > { %p143_p10 = pnand %p363_p6, %p142_p9 }
   0xe   : > { %v212_v0 = vld [vmem:[%s658_s1] sm:$0xff] (!%p143_p10)  ;;  %p170_p11 = scmp.lt.s32.totalorder (!%p143_p10), %s509_s12, 1  ;;  %v519_v1 = vmov (!%p143_p10), 1   ;;  %v520_v2 = vmov (!%p143_p10), 0   ;;  %vm187_vm0 = vcmask (!%p143_p10), 123904   ;;  %vm194_vm1 = vcmask (!%p143_p10), 125954  }
   0xf   : > { %146 = sbr.rel (%p143_p10) target bundleno = 398 (0x18e), region = 28  ;;  %436 = vset.pattern.permute.xlu0 (!%p143_p10), %v519_v1  ;;  %438 = vset.pattern.permute.xlu1 (!%p143_p10), %v520_v2  ;;  %vm201_vm2 = vcmask (!%p143_p10), 128004   ;;  %vm208_vm3 = vcmask (!%p143_p10), 130054   ;;  %vm210_vm4 = vcmask (!%p143_p10), 138368   ;;  %v521_v3 = vmov (!%p143_p10), 2   ;;  %s523_s30 = smov (!%p143_p10), 127  }
  0x10   : > { %225 = vperm.xlu0 (!%p143_p10), %436, %v212_v0   ;;  %217 = vperm.xlu1 (!%p143_p10), %438, %v212_v0   ;;  %v522_v8 = vmov (!%p143_p10), 0.0   ;;  %s524_s3 = smov (!%p143_p10), 126   ;;  %s525_s4 = smov (!%p143_p10), 1   ;;  %vm252_vm5 = vcmask (!%p143_p10), 7168   ;;  %vm255_vm6 = vcmask (!%p143_p10), 130048  }
  0x11   : > { %s167_s5 = sand.u32 (!%p143_p10), 1, %s501_s10   ;;  %s371_s7 = sshll.u32 (!%p143_p10), %s509_s12, 7 }
  0x12   : > { %s364_s6 = sshll.u32 (!%p143_p10), %s167_s5, 3  ;;  %s610_s20 = scalar_lea.hbm (!%p143_p10), %s659_s2, %s371_s7 }
  0x13   : > { %s169_s8 = scalar_lea.vmem (!%p143_p10), [#allocation3], %s364_s6  ;;  %s258_s23 = scalar_lea.sflag (!%p143_p10), [#allocation4], %s167_s5 }
  0x14   : > { %437 = vset.pattern.permute.xlu0 (!%p143_p10), %v521_v3  ;;  %s272_s15 = sshll.u32 (!%p143_p10), %s169_s8, 4  ;;  %s526_s24 = smov (!%p143_p10), [#allocation3]   ;;  %s612_s15 = int_to_ptr.vmem [resolvable:$true] %s272_s15 }
  0x15   : > { %236 = vperm.xlu0 (!%p143_p10), %437, %v212_v0  }
  0x16   : > { %s171_s25 = scalar_select %p170_p11, %s509_s12, 1 }
  0x17   : > { %s439_s12 = scalar_lea.vmem %s612_s15, 128 }
  0x18   : > { %s365_s26 = sshll.u32 %s171_s25, 2  ;;  %p440_p12 = scmp.ne.s32.totalorder %s612_s15, %s439_s12 }
  0x19   : > { %s176_s29 = scalar_lea.vmem %s657_s0, %s365_s26  ;;  %s443_s25 = sshll.u32 %s526_s24, 4  ;;  %s444_s25 = int_to_ptr.vmem [resolvable:$false] %s443_s25 }
  0x1a   : > { %v366_v4 = vld [vmem:[%s176_s29] ss:$0 sm:$0xff]  ;;  %v367_v5 = vld [vmem:[%s176_s29 + $0x1] ss:$0 sm:$0xff]  ;;  %v368_v6 = vld [vmem:[%s176_s29 + $0x2] ss:$0 sm:$0xff]  ;;  %p441_p13 = pnand %p440_p12, %p582_p4  ;;  %p446_p1 = scmp.lt.s32.totalorder %s612_s15, %s444_s25 }
  0x1b   : > { %188 = vst.msk [vmem:[#allocation2 + $0x8] sm:$0x3] %vm187_vm0, %v366_v4  ;;  %v369_v7 = vld [vmem:[%s176_s29 + $0x3] ss:$0 sm:$0xff]  ;;  %s445_s26 = scalar_lea.vmem %s444_s25, 256 }
  0x1c   : > { %195 = vst.msk [vmem:[#allocation2 + $0x8] sm:$0xc] %vm194_vm1, %v367_v5  ;;  %p442_p0 = pneg %p441_p13  ;;  %p447_p2 = scmp.lt.s32.totalorder %s445_s26, %s439_s12 }
  0x1d   : > { %202 = vst.msk [vmem:[#allocation2 + $0x8] sm:$0x30] %vm201_vm2, %v368_v6 }
  0x1e   : > { %209 = vst.msk [vmem:[#allocation2 + $0x8] sm:$0xc0] %vm208_vm3, %v369_v7  ;;  %p448_p3 = por %p447_p2, %p446_p1 }
  0x1f   : > { %211 = vst.msk [vmem:[#allocation2 + $0x8] sm:$0xff] %vm210_vm4, %v522_v8 }
  0x20   : > { %p449_p5 = pnand %p448_p3, %p442_p0 }
  0x26   : > { %v214_v9 = vld [vmem:[#allocation2 + $0x8] sm:$0xff] }
  0x8f   : > { %v226_v10 = vpop.permute.xlu0 %225  ;;  %v218_v14 = vpop.permute.xlu1 %217 }
  0x90   : > { %v228_v11 = vmul.f32 %v226_v10, %v214_v9  ;;  %v220_v15 = vmul.f32 0.0, %v218_v14  ;;  %v221_v16 = vmul.f32 %v218_v14, %v214_v9 }
  0x92   : > { %230 = vrot.lane.b32.xlu1 %v228_v11, %s523_s30 }
  0x94   : > { %v237_v12 = vpop.permute.xlu0 %236 }
  0x95   : > { %v239_v13 = vmul.f32 %v237_v12, %v214_v9 }
  0x97   : > { %241 = vrot.lane.b32.xlu1 %v239_v13, %s524_s3 }
 0x104   : > { %v231_v17 = vpop.permute.xlu1 %230 }
 0x105   : > { %v233_v18 = vadd.f32 %v231_v17, %v220_v15  ;;  %v234_v19 = vadd.f32 %v231_v17, %v221_v16 }
 0x109   : > { %v242_v20 = vpop.permute.xlu1 %241 }
 0x10a   : > { %v244_v21 = vadd.f32 %v242_v20, %v233_v18  ;;  %v245_v22 = vadd.f32 %v242_v20, %v234_v19 }
 0x10c   : > { %248 = vrot.lane.b32.xlu0 %v244_v21, %s525_s4  ;;  %250 = vrot.lane.b32.xlu1 %v245_v22, %s525_s4 }
 0x17e   : > { %v249_v23 = vpop.permute.xlu0 %248  ;;  %v251_v24 = vpop.permute.xlu1 %250 }
 0x17f   : > { %v253_v25 = vsel %vm252_vm5, %v249_v23, %v251_v24 }
 0x180   : > { %256 = vst.msk [vmem:[%s169_s8] sm:$0xff] %vm255_vm6, %v253_v25 }
 0x181   : > { %452 = shalt.err (!%p449_p5)
}
 0x182   : > { %s453_s27 = scalar_lea.hbm %s610_s20, 128  ;;  %s457_s30 = scalar_lea.hbm %s659_s2, 256 }
 0x183   : > { %p454_p6 = scmp.ne.s32.totalorder %s610_s20, %s453_s27  ;;  %p458_p10 = scmp.lt.u32.totalorder %s610_s20, %s659_s2 }
 0x184   : > { %p459_p11 = scmp.lt.u32.totalorder %s457_s30, %s453_s27  ;;  %p461_p13 = scmp.lt.u32.totalorder %s453_s27, %s610_s20 }
 0x185   : > { %p455_p7 = pnand %p454_p6, %p582_p4 }
 0x186   : > { %p460_p12 = por %p459_p11, %p458_p10 }
 0x187   : > { %p456_p9 = pneg %p455_p7 }
 0x188   : > { %p462_p0 = por %p461_p13, %p460_p12 }
 0x18a   : > { %p463_p1 = pnand %p462_p0, %p456_p9 }
 0x18c   : > { %466 = shalt.err (!%p463_p1)
}
 0x18d   : > { %374 = dma.vmem_to_hbm [thread:$0]  (%p582_p4), %s612_s15, 128, %s610_s20, %s258_s23  }
 0x18e PF: > { %p380_p2 = scmp.ge.s32.totalorder %s517_s14, 2  ;;  %s284_s5 = sand.u32 1, %s497_s9  }
 0x18f   : > { %s285_s6 = scalar_lea.sflag [#allocation4], %s284_s5 }
 0x190   : > { %p377_p3 = pnand %p380_p2, %p589_p8 }
 0x192   : > { %492 = dma.done.wait (!%p377_p3), %s285_s6, 128  }
 0x193   : > { %494 = vsyncadd (!%p377_p3), %s285_s6, 4294967168  ;;  %s15_s14 = sadd.s32 1, %s517_s14   ;;  %s662_s9 = smov %s501_s10 }
 0x194   : > { %p12_p5 = scmp.ge.s32.totalorder %s15_s14, 4   ;;  %s663_s10 = smov %s505_s11 }
 0x195   : > { %s664_s11 = smov %s595_s22  ;;  %s665_s12 = smov %s513_s13 }
 0x196   : > { %s666_s13 = smov %s668_s17  ;;  %14 = sbr.rel (!%p12_p5) target bundleno = 4 (0x4), region = 66 }
 0x19d   :  { %290 = vsyncpa [#allocation4], 1 }
 0x19e   :  { %292 = vsyncpa [#allocation4 + $0x1], 1 }

</bundles_post_ra>
